<compile_context>
chip_gen: v7x
topology: tpu7x:2x2x1
jax: 0.10.0
libtpu: 0.0.40
codegen_flags: <defaults>
</compile_context>

<pallas_src>
import jax
import jax.numpy as jnp
import numpy as np
from jax import lax
from jax.experimental import pallas as pl
from jax.experimental.pallas import tpu as pltpu

f32 = jnp.float32
bf16 = jnp.bfloat16


def _round_up(a, m):
    return -(-a // m) * m


def _vmem_limit_bytes():
    """~3/4 of physical VMEM: 96 MiB on 128-MiB v5e/v6e, 48 MiB on 64-MiB v7x."""
    cap = None
    try:
        cap = getattr(pltpu.get_tpu_info(), "vmem_capacity_bytes", None)
    except Exception:
        cap = None
    if not cap or cap < (8 << 20):
        cap = 64 << 20  # conservative (v7x-sized) fallback
    return int(cap * 3 // 4)


def _choose_tiling(L, C, vmem_limit, tile_l=None):
    """Largest lane tile (multiple of 128) fitting the per-step VMEM budget with
    <= ~6% padding waste.  L is zero-padded up to a multiple of the tile."""
    if tile_l is not None:
        t = int(tile_l)
        assert t % 128 == 0, "tile_l must be a multiple of 128"
        return t, _round_up(L, t)
    budget = max(vmem_limit // 2, 2 << 20)
    best = 128
    for t in (4096, 2048, 1024, 512, 256, 128):
        # double-buffered f32 x in + f32 out + f32 y temp + bf16 x temp + W_eff
        live = t * C * (8 + 8 + 4 + 2) + 4 * C * C + 256 * C
        if live > budget:
            continue
        l_pad = _round_up(L, t)
        if l_pad == L or (l_pad - L) * 16 <= L or t == 128:
            best = t
            break
    return best, _round_up(L, best)


# ----------------------------------------------------------------------------
# Pass 1: conv_state / conv_proj + Gram-matrix accumulation over L tiles.
# ----------------------------------------------------------------------------
def gram_kernel(x_ref,            # (1, C, TL)  f32
                ws_ref, bs_ref,   # (S, C) bf16, (S, 1) f32
                wp_ref, bp_ref,   # (Nn, C) bf16, (Nn, 1) f32
                xn_ref):          # (1, S, Nn) f32 out, accumulated over L tiles
    l = pl.program_id(2)

    @pl.when(l == 0)
    def _():
        xn_ref[...] = jnp.zeros_like(xn_ref)

    x = x_ref[0].astype(bf16)                                            # (C, TL)
    x_state = jnp.dot(ws_ref[...], x, preferred_element_type=f32) + bs_ref[...]
    x_proj = jnp.dot(wp_ref[...], x, preferred_element_type=f32) + bp_ref[...]
    # Gram over the lane dim: contract dim 1 of both operands -> (S, Nn).
    xn_ref[0] += lax.dot_general(
        x_state.astype(bf16), x_proj.astype(bf16),
        dimension_numbers=(((1,), (1,)), ((), ())),
        preferred_element_type=f32)


# ----------------------------------------------------------------------------
# Pass 2: y = W_eff @ x + b_eff, emitting only BN partial statistics.
# ----------------------------------------------------------------------------
def stats_kernel(x_ref,            # (1, C, TL) f32
                 weff_ref,         # (1, C, C)  bf16
                 beff_ref,         # (1, C, 1)  f32
                 ysum_ref,         # (1, C, 1)  f32 out, accumulated over L tiles
                 ysq_ref):         # (1, C, 1)  f32 out, accumulated over L tiles
    l = pl.program_id(2)

    @pl.when(l == 0)
    def _():
        ysum_ref[...] = jnp.zeros_like(ysum_ref)
        ysq_ref[...] = jnp.zeros_like(ysq_ref)

    x = x_ref[0].astype(bf16)                                            # (C, TL)
    y = jnp.dot(weff_ref[0], x, preferred_element_type=f32) + beff_ref[0]
    ysum_ref[0] += jnp.sum(y, axis=-1, keepdims=True)
    ysq_ref[0] += jnp.sum(y * y, axis=-1, keepdims=True)


# ----------------------------------------------------------------------------
# Pass 3: recompute y from the x tile, BatchNorm + residual, f32 output.
# ----------------------------------------------------------------------------
def bn_residual_kernel(x_ref,        # (1, C, TL) f32
                       weff_ref,     # (1, C, C)  bf16
                       beff_ref,     # (1, C, 1)  f32
                       scale_ref,    # (C, 1) f32
                       shift_ref,    # (C, 1) f32
                       o_ref):       # (1, C, TL) f32
    xf = x_ref[0]
    y = jnp.dot(weff_ref[0], xf.astype(bf16),
                preferred_element_type=f32) + beff_ref[0]
    o_ref[0] = xf + y * scale_ref[...] + shift_ref[...]


# ----------------------------------------------------------------------------
# Wrapper
# ----------------------------------------------------------------------------
def glore_unit_concat(x, params, *, normalize=False, eps=1e-4,
                      tile_l=None, l_split=1):
    """x: (N, C, D, H, W) float32.  Returns (N, C, D, H, W) float32."""
    N, C, D, H, W = x.shape
    L = D * H * W
    S = params["ws"].shape[0]    # num_s
    Nn = params["wp"].shape[0]   # num_n

    vmem_limit = _vmem_limit_bytes()
    tile, L_pad = _choose_tiling(L, C, vmem_limit, tile_l)
    LT = L_pad // tile
    assert LT % l_split == 0, "l_split must divide the number of L tiles"
    chunk = LT // l_split
    pad = L_pad - L

    x_f32 = x.reshape(N, C, L).astype(f32)
    x_in = jnp.pad(x_f32, ((0, 0), (0, 0), (0, pad))) if pad else x_f32

    ws = params["ws"].astype(bf16)
    wp = params["wp"].astype(bf16)
    bs = params["bs"].astype(f32)
    bp = params["bp"].astype(f32)

    x_spec3 = pl.BlockSpec((1, C, tile), lambda p, b, l: (b, 0, p * chunk + l))

    def const3(shape):
        return pl.BlockSpec(shape, lambda p, b, l: (0,) * len(shape))

    def acc_spec3(shape):
        return pl.BlockSpec(shape, lambda p, b, l: (p * N + b, 0, 0))

    cparams_acc = pltpu.CompilerParams(
        dimension_semantics=("parallel", "parallel", "arbitrary"),
        vmem_limit_bytes=vmem_limit)

    # --- Pass 1: Gram matrix partials (l_split*N, S, Nn) ---------------------
    xn_part = pl.pallas_call(
        gram_kernel,
        out_shape=jax.ShapeDtypeStruct((l_split * N, S, Nn), f32),
        grid=(l_split, N, chunk),
        in_specs=[x_spec3, const3((S, C)), const3((S, 1)),
                  const3((Nn, C)), const3((Nn, 1))],
        out_specs=acc_spec3((1, S, Nn)),
        compiler_params=cparams_acc,
    )(x_in, ws, bs, wp, bp)

    xn = jnp.sum(xn_part.reshape(l_split, N, S, Nn), axis=0)          # (N, S, Nn)
    if pad:
        # exact removal of the zero-padded columns' (bs x bp^T) contributions
        bs_q = bs[:, 0].astype(bf16).astype(f32)
        bp_q = bp[:, 0].astype(bf16).astype(f32)
        xn = xn - pad * jnp.outer(bs_q, bp_q)[None]
    if normalize:
        xn = xn * (1.0 / L)

    # --- Tiny GCN_node / GCN_channel on (N, S, Nn): plain-JAX glue (f32) -----
    h = jnp.einsum("nsm,im->nsi", xn, params["w1"]) + params["b1"][None]
    h = jnp.maximum(h + xn, 0.0)
    x_rel = jnp.einsum("nsm,im->nsi", h, params["w2"])
    x_rel_c = jnp.einsum("ij,njm->nim", params["wc"], xn) + params["bc"][None]
    z = x_rel + x_rel_c                                                # (N, S, Nn)

    # Fold back-projection + conv_extend:  y = W_eff @ x + b_eff
    weff = jnp.einsum("cs,nsm,mk->nck", params["we"], z, params["wp"])  # (N, C, C)
    beff = jnp.einsum("cs,nsm,mo->nco", params["we"], z, params["bp"])  # (N, C, 1)
    weff_bf = weff.astype(bf16)

    # --- Pass 2: BN partial sums only (y never written to HBM) ---------------
    ysum_part, ysq_part = pl.pallas_call(
        stats_kernel,
        out_shape=(jax.ShapeDtypeStruct((l_split * N, C, 1), f32),
                   jax.ShapeDtypeStruct((l_split * N, C, 1), f32)),
        grid=(l_split, N, chunk),
        in_specs=[x_spec3,
                  pl.BlockSpec((1, C, C), lambda p, b, l: (b, 0, 0)),
                  pl.BlockSpec((1, C, 1), lambda p, b, l: (b, 0, 0))],
        out_specs=[acc_spec3((1, C, 1)), acc_spec3((1, C, 1))],
        compiler_params=cparams_acc,
    )(x_in, weff_bf, beff)

    s1 = jnp.sum(ysum_part, axis=(0, 2))                              # (C,)
    s2 = jnp.sum(ysq_part, axis=(0, 2))                               # (C,)
    if pad:
        # padded columns contribute exactly b_eff (and b_eff^2) per channel
        s1 = s1 - pad * jnp.sum(beff[:, :, 0], axis=0)
        s2 = s2 - pad * jnp.sum(beff[:, :, 0] ** 2, axis=0)

    # BatchNorm3d training-mode statistics (biased variance, eps=1e-4)
    cnt = float(N * L)
    mean = s1 / cnt
    var = jnp.maximum(s2 / cnt - mean * mean, 0.0)
    # TODO(synk): E[y^2]-mean^2 can cancel badly if |mean| >> std; switch to
    # shifted/Welford partial sums if production activations are far from zero-mean.
    scale = params["bn_gamma"] / jnp.sqrt(var + eps)                  # (C,)
    shift = params["bn_beta"] - mean * scale                          # (C,)

    # --- Pass 3: recompute y + BN + residual ---------------------------------
    x_spec2 = pl.BlockSpec((1, C, tile), lambda b, l: (b, 0, l))
    out_pad = pl.pallas_call(
        bn_residual_kernel,
        out_shape=jax.ShapeDtypeStruct((N, C, L_pad), f32),
        grid=(N, LT),
        in_specs=[x_spec2,
                  pl.BlockSpec((1, C, C), lambda b, l: (b, 0, 0)),
                  pl.BlockSpec((1, C, 1), lambda b, l: (b, 0, 0)),
                  pl.BlockSpec((C, 1), lambda b, l: (0, 0)),
                  pl.BlockSpec((C, 1), lambda b, l: (0, 0))],
        out_specs=x_spec2,
        compiler_params=pltpu.CompilerParams(
            dimension_semantics=("parallel", "parallel"),
            vmem_limit_bytes=vmem_limit),
    )(x_in, weff_bf, beff, scale[:, None], shift[:, None])

    out = out_pad[:, :, :L] if pad else out_pad
    return out.reshape(N, C, D, H, W)


# ----------------------------------------------------------------------------
# Pure-JAX reference mirroring the kernel's precision policy (bf16 operands for
# the big streaming matmuls, f32 accumulation, f32 everywhere else).
# ----------------------------------------------------------------------------
def glore_reference(x, p, normalize=False, eps=1e-4):
    N, C, D, H, W = x.shape
    L = D * H * W
    xf = x.reshape(N, C, L).astype(f32)
    xb = xf.astype(bf16)
    ws, wp = p["ws"].astype(bf16), p["wp"].astype(bf16)

    x_state = jnp.einsum("sc,ncl->nsl", ws, xb, preferred_element_type=f32) + p["bs"][None]
    x_proj = jnp.einsum("mc,ncl->nml", wp, xb, preferred_element_type=f32) + p["bp"][None]
    xn = jnp.einsum("nsl,nml->nsm", x_state.astype(bf16), x_proj.astype(bf16),
                    preferred_element_type=f32)
    if normalize:
        xn = xn * (1.0 / L)
    # GCN_node
    h = jnp.einsum("nsm,im->nsi", xn, p["w1"]) + p["b1"][None]
    h = jnp.maximum(h + xn, 0.0)
    x_rel = jnp.einsum("nsm,im->nsi", h, p["w2"])
    # GCN_channel
    x_rel_c = jnp.einsum("ij,njm->nim", p["wc"], xn) + p["bc"][None]
    z = x_rel + x_rel_c
    # folded back-projection + conv_extend
    weff = jnp.einsum("cs,nsm,mk->nck", p["we"], z, p["wp"])
    beff = jnp.einsum("cs,nsm,mo->nco", p["we"], z, p["bp"])
    y = jnp.einsum("nck,nkl->ncl", weff.astype(bf16), xb,
                   preferred_element_type=f32) + beff
    # BN training-mode batch statistics (biased variance)
    mean = jnp.mean(y, axis=(0, 2), keepdims=True)
    var = jnp.maximum(jnp.mean(y * y, axis=(0, 2), keepdims=True) - mean * mean, 0.0)
    scale = p["bn_gamma"][None, :, None] / jnp.sqrt(var + eps)
    shift = p["bn_beta"][None, :, None] - mean * scale
    return (xf + y * scale + shift).reshape(N, C, D, H, W)


def make_params(key, num_in, num_mid):
    S, Nn = 2 * num_mid, num_mid
    ks = jax.random.split(key, 8)
    return {
        "ws": 0.1 * jax.random.normal(ks[0], (S, num_in), f32),
        "bs": 0.1 * jax.random.normal(ks[1], (S, 1), f32),
        "wp": 0.1 * jax.random.normal(ks[2], (Nn, num_in), f32),
        "bp": 0.1 * jax.random.normal(ks[3], (Nn, 1), f32),
        "w1": 0.1 * jax.random.normal(ks[4], (Nn, Nn), f32),
        "b1": 0.1 * jax.random.normal(ks[5], (1, Nn), f32),
        "w2": 0.1 * jax.random.normal(ks[6], (Nn, Nn), f32),
        "wc": 0.1 * jax.random.normal(ks[7], (S, S), f32),
        "bc": 0.05 * jnp.ones((S, 1), f32),
        "we": 0.1 * jax.random.normal(jax.random.fold_in(key, 99), (num_in, S), f32),
        "bn_gamma": jnp.ones((num_in,), f32),   # torch BN default init
        "bn_beta": jnp.zeros((num_in,), f32),
    }


if __name__ == "__main__":
    key = jax.random.PRNGKey(0)
    num_in, num_mid = 4, 4            # -> num_s = 8, num_n = 4
    N, D, H, W = 2, 4, 16, 16         # L = 1024

    kx, kp = jax.random.split(key)
    x = jax.random.normal(kx, (N, num_in, D, H, W), jnp.float32)
    params = make_params(kp, num_in, num_mid)

    # 1) Default module behaviour (normalize=False), auto tile sizing.
    out = jax.block_until_ready(glore_unit_concat(x, params))
    ref = glore_reference(x, params)
    np.testing.assert_allclose(np.asarray(out), np.asarray(ref), rtol=5e-3, atol=5e-3)

    # 2) normalize=True, multi-tile accumulation and 2-way L split (dual-TC path).
    out_n = jax.block_until_ready(
        glore_unit_concat(x, params, normalize=True, tile_l=256, l_split=2))
    ref_n = glore_reference(x, params, normalize=True)
    np.testing.assert_allclose(np.asarray(out_n), np.asarray(ref_n), rtol=5e-3, atol=5e-3)

    # 3) Non-128-aligned spatial size (L = 3*10*10 = 300 -> padded to 384).
    x2 = jax.random.normal(jax.random.fold_in(key, 7), (N, num_in, 3, 10, 10), jnp.float32)
    out2 = jax.block_until_ready(glore_unit_concat(x2, params))
    ref2 = glore_reference(x2, params)
    np.testing.assert_allclose(np.asarray(out2), np.asarray(ref2), rtol=5e-3, atol=5e-3)

    print("KERNEL_OK")
</pallas_src>

<mosaic_0001>
module attributes {stable_mosaic.version = 11 : i64} {
  func.func @gram_kernel(%arg0: i32, %arg1: i32, %arg2: i32, %arg3: memref<1x4x1024xf32, #tpu.memory_space<vmem>>, %arg4: memref<8x4xbf16, #tpu.memory_space<vmem>>, %arg5: memref<8x1xf32, #tpu.memory_space<vmem>>, %arg6: memref<4x4xbf16, #tpu.memory_space<vmem>>, %arg7: memref<4x1xf32, #tpu.memory_space<vmem>>, %arg8: memref<1x8x4xf32, #tpu.memory_space<vmem>>) attributes {dimension_semantics = [#tpu.dimension_semantics<parallel>, #tpu.dimension_semantics<parallel>, #tpu.dimension_semantics<arbitrary>], iteration_bounds = array<i64: 1, 2, 1>, scalar_prefetch = 0 : i64, scratch_operands = 0 : i64, tpu.core_type = #tpu.core_type<tc>, window_params = [{transform_indices = @transform_0, window_bounds = array<i64: 1, 4, 1024>}, {pipeline_mode = #tpu.pipeline_mode<synchronous>, transform_indices = @transform_1, window_bounds = array<i64: 8, 4>}, {pipeline_mode = #tpu.pipeline_mode<synchronous>, transform_indices = @transform_2, window_bounds = array<i64: 8, 1>}, {pipeline_mode = #tpu.pipeline_mode<synchronous>, transform_indices = @transform_3, window_bounds = array<i64: 4, 4>}, {pipeline_mode = #tpu.pipeline_mode<synchronous>, transform_indices = @transform_4, window_bounds = array<i64: 4, 1>}, {transform_indices = @transform_5, window_bounds = array<i64: 1, 8, 4>}]} {
    %c0_i32 = arith.constant 0 : i32
    %0 = arith.cmpi eq, %arg2, %c0_i32 : i32
    %1 = arith.extui %0 : i1 to i32
    %c0_i32_0 = arith.constant 0 : i32
    %2 = arith.cmpi ne, %1, %c0_i32_0 : i32
    scf.if %2 {
      %cst_19 = arith.constant 0.000000e+00 : f32
      %25 = vector.broadcast %cst_19 : f32 to vector<1x8x4xf32>
      %c0_20 = arith.constant 0 : index
      %c0_21 = arith.constant 0 : index
      %c0_22 = arith.constant 0 : index
      %26 = vector.load %arg8[%c0_20, %c0_21, %c0_22] : memref<1x8x4xf32, #tpu.memory_space<vmem>>, vector<1x8x4xf32>
      tpu.vector_store %arg8[%c0_20, %c0_21, %c0_22], %25 {strides = array<i32>} : memref<1x8x4xf32, #tpu.memory_space<vmem>>, vector<1x8x4xf32>,
    } else {
    }
    %c0 = arith.constant 0 : index
    %c0_1 = arith.constant 0 : index
    %c0_2 = arith.constant 0 : index
    %3 = vector.load %arg3[%c0, %c0_1, %c0_2] : memref<1x4x1024xf32, #tpu.memory_space<vmem>>, vector<1x4x1024xf32>
    %4 = vector.shape_cast %3 : vector<1x4x1024xf32> to vector<4x1024xf32>
    %5 = arith.truncf %4 : vector<4x1024xf32> to vector<4x1024xbf16>
    %c0_3 = arith.constant 0 : index
    %c0_4 = arith.constant 0 : index
    %6 = vector.load %arg4[%c0_3, %c0_4] : memref<8x4xbf16, #tpu.memory_space<vmem>>, vector<8x4xbf16>
    %cst = arith.constant dense<0.000000e+00> : vector<8x1024xf32>
    %7 = tpu.matmul %6, %5, %cst {dimension_numbers = #tpu.dot_dimension_numbers<[1], [0], [0], [1], [0, 0, 1, 1], [], []>} : vector<8x4xbf16>, vector<4x1024xbf16>, vector<8x1024xf32> -> vector<8x1024xf32>
    %c0_5 = arith.constant 0 : index
    %c0_6 = arith.constant 0 : index
    %8 = vector.load %arg5[%c0_5, %c0_6] : memref<8x1xf32, #tpu.memory_space<vmem>>, vector<8x1xf32>
    %9 = vector.broadcast %8 : vector<8x1xf32> to vector<8x1024xf32>
    %10 = arith.addf %7, %9 : vector<8x1024xf32>
    %c0_7 = arith.constant 0 : index
    %c0_8 = arith.constant 0 : index
    %11 = vector.load %arg6[%c0_7, %c0_8] : memref<4x4xbf16, #tpu.memory_space<vmem>>, vector<4x4xbf16>
    %cst_9 = arith.constant dense<0.000000e+00> : vector<4x1024xf32>
    %12 = tpu.matmul %11, %5, %cst_9 {dimension_numbers = #tpu.dot_dimension_numbers<[1], [0], [0], [1], [0, 0, 1, 1], [], []>} : vector<4x4xbf16>, vector<4x1024xbf16>, vector<4x1024xf32> -> vector<4x1024xf32>
    %c0_10 = arith.constant 0 : index
    %c0_11 = arith.constant 0 : index
    %13 = vector.load %arg7[%c0_10, %c0_11] : memref<4x1xf32, #tpu.memory_space<vmem>>, vector<4x1xf32>
    %14 = vector.broadcast %13 : vector<4x1xf32> to vector<4x1024xf32>
    %15 = arith.addf %12, %14 : vector<4x1024xf32>
    %c0_12 = arith.constant 0 : index
    %c0_13 = arith.constant 0 : index
    %c0_14 = arith.constant 0 : index
    %16 = vector.load %arg8[%c0_12, %c0_13, %c0_14] : memref<1x8x4xf32, #tpu.memory_space<vmem>>, vector<1x8x4xf32>
    %17 = vector.shape_cast %16 : vector<1x8x4xf32> to vector<8x4xf32>
    %18 = arith.truncf %10 : vector<8x1024xf32> to vector<8x1024xbf16>
    %19 = arith.truncf %15 : vector<4x1024xf32> to vector<4x1024xbf16>
    %cst_15 = arith.constant dense<0.000000e+00> : vector<8x4xf32>
    %20 = tpu.matmul %18, %19, %cst_15 {dimension_numbers = #tpu.dot_dimension_numbers<[1], [1], [0], [0], [0, 0, 1, 0], [], []>} : vector<8x1024xbf16>, vector<4x1024xbf16>, vector<8x4xf32> -> vector<8x4xf32>
    %21 = arith.addf %17, %20 : vector<8x4xf32>
    %c0_16 = arith.constant 0 : index
    %c0_17 = arith.constant 0 : index
    %c0_18 = arith.constant 0 : index
    %22 = vector.load %arg8[%c0_16, %c0_17, %c0_18] : memref<1x8x4xf32, #tpu.memory_space<vmem>>, vector<1x8x4xf32>
    %23 = vector.shape_cast %22 : vector<1x8x4xf32> to vector<8x4xf32>
    %24 = vector.shape_cast %21 : vector<8x4xf32> to vector<1x8x4xf32>
    tpu.vector_store %arg8[%c0_16, %c0_17, %c0_18], %24 {strides = array<i32>} : memref<1x8x4xf32, #tpu.memory_space<vmem>>, vector<1x8x4xf32>,
    return
  }
  func.func @transform_0(%arg0: i32, %arg1: i32, %arg2: i32) -> (i32, i32, i32) {
    %c1_i32 = arith.constant 1 : i32
    %0 = arith.muli %arg0, %c1_i32 : i32
    %1 = arith.addi %0, %arg2 : i32
    %c0_i32 = arith.constant 0 : i32
    %c0_i32_0 = arith.constant 0 : i32
    return %arg1, %c0_i32, %1 : i32, i32, i32
  }
  func.func @transform_1(%arg0: i32, %arg1: i32, %arg2: i32) -> (i32, i32) {
    %c0_i32 = arith.constant 0 : i32
    %c0_i32_0 = arith.constant 0 : i32
    %c0_i32_1 = arith.constant 0 : i32
    return %c0_i32, %c0_i32_0 : i32, i32
  }
  func.func @transform_2(%arg0: i32, %arg1: i32, %arg2: i32) -> (i32, i32) {
    %c0_i32 = arith.constant 0 : i32
    %c0_i32_0 = arith.constant 0 : i32
    %c0_i32_1 = arith.constant 0 : i32
    return %c0_i32, %c0_i32_0 : i32, i32
  }
  func.func @transform_3(%arg0: i32, %arg1: i32, %arg2: i32) -> (i32, i32) {
    %c0_i32 = arith.constant 0 : i32
    %c0_i32_0 = arith.constant 0 : i32
    %c0_i32_1 = arith.constant 0 : i32
    return %c0_i32, %c0_i32_0 : i32, i32
  }
  func.func @transform_4(%arg0: i32, %arg1: i32, %arg2: i32) -> (i32, i32) {
    %c0_i32 = arith.constant 0 : i32
    %c0_i32_0 = arith.constant 0 : i32
    %c0_i32_1 = arith.constant 0 : i32
    return %c0_i32, %c0_i32_0 : i32, i32
  }
  func.func @transform_5(%arg0: i32, %arg1: i32, %arg2: i32) -> (i32, i32, i32) {
    %c2_i32 = arith.constant 2 : i32
    %0 = arith.muli %arg0, %c2_i32 : i32
    %1 = arith.addi %0, %arg1 : i32
    %c0_i32 = arith.constant 0 : i32
    %c0_i32_0 = arith.constant 0 : i32
    %c0_i32_1 = arith.constant 0 : i32
    return %1, %c0_i32, %c0_i32_0 : i32, i32, i32
  }
}

</mosaic_0001>

<bundles_post_ra>
// kernel: tpu_custom_call.1
= control target key start
LH: loop header
LB: loop body
LE: loop exit
PB: predicated region body
PF: predicated region fallthrough
CT: control target
= control target key end

     0   :  { %10 = vsyncpa [#allocation3], 0  ;;  %s1324_s0 = inlined_call_operand.hbm [shape: f32[2,4,1024], index: 0, kind: input, shape index: {}]   ;;  %s1325_s1 = inlined_call_operand.vmem [shape: bf16[8,4], index: 1, kind: input, shape index: {}]   ;;  %s1326_s2 = inlined_call_operand.vmem [shape: f32[8,1], index: 2, kind: input, shape index: {}]   ;;  %s1327_s3 = inlined_call_operand.vmem [shape: bf16[4,4], index: 3, kind: input, shape index: {}]   ;;  %s1328_s4 = inlined_call_operand.vmem [shape: f32[4,1], index: 4, kind: input, shape index: {}]   ;;  %s1329_s5 = inlined_call_operand.vmem [shape: f32[2,8,4], index: 5, kind: output, shape index: {}]  }
   0x1   :  { %12 = vsyncpa [#allocation3 + $0x1], 0  ;;  %s1155_s18 = smov 0   ;;  %s1157_s19 = smov 0  }
   0x2   :  { %s1159_s20 = smov 0   ;;  %s1161_s21 = smov 0  }
   0x3   :  { %s1163_s22 = smov 0   ;;  %s1165_s23 = smov 0  }
   0x4 LB: > { %s949_s24 = sadd.s32 4294967295, %s1120_s23   ;;  %s33_s25 = sadd.s32 1, %s1116_s22  ;;  %s1120_s23 = sphi %s1165_s23, %s18_s23   ;;  %s1116_s22 = sphi %s1163_s22, %s1339_s22   ;;  %s1112_s21 = sphi %s1161_s21, %s1338_s21   ;;  %s1108_s20 = sphi %s1159_s20, %s1337_s20   ;;  %s1104_s19 = sphi %s1157_s19, %s1336_s19   ;;  %s1100_s18 = sphi %s1155_s18, %s1335_s18  }
   0x5   : > { %p35_p0 = scmp.ge.s32.totalorder %s33_s25, 2  ;;  %s48_s26 = sadd.s32 1, %s1108_s20 }
   0x6   : > { %p55_p1 = scmp.ne.s32.totalorder %s1108_s20, %s1104_s19  ;;  %p56_p2 = scmp.eq.s32.totalorder %s1120_s23, 0 }
   0x7   : > { %s1341_s25 = smov (%p35_p0, %s33_s25), 0  ;;  %p61_p4 = scmp.ne.s32.totalorder %s1104_s19, %s1100_s18 }
   0x8   : > { %p1191_p3 = por %p56_p2, %p55_p1  ;;  %s43_s28 = ssub.s32 %s1116_s22, %s1341_s25 }
   0x9   : > { %p62_p5 = scmp.eq.s32.totalorder %s949_s24, 0  ;;  %p46_p6 = scmp.eq.s32.totalorder %s43_s28, 0 }
   0xa   : > { %p984_p8 = scmp.lt.s32.totalorder %s1120_s23, 2  ;;  %s211_s6 = sand.u32 1, %s1108_s20  }
   0xb   : > { %p1198_p7 = por %p62_p5, %p61_p4  ;;  %s977_s7 = sshll.u32 %s1116_s22, 9 }
   0xc   : > { %s1204_s30 = scalar_select %p46_p6, %s1108_s20, %s48_s26  }
   0xd   : > { %s953_s8 = sshll.u32 %s211_s6, 5  ;;  %s1211_s11 = scalar_lea.hbm %s1324_s0, %s977_s7 }
   0xe   : > { %s215_s12 = scalar_lea.vmem [#allocation2], %s953_s8  ;;  %p1215_p9 = pnand %p984_p8, %p1191_p3 }
   0xf   : > { %s226_s13 = sshll.u32 %s215_s12, 4  ;;  %s212_s15 = scalar_lea.sflag [#allocation3], %s211_s6  ;;  %s1219_s13 = int_to_ptr.vmem [resolvable:$true] %s226_s13 }
  0x10   : > { %s1040_s16 = scalar_lea.hbm %s1211_s11, 512  ;;  %p1042_p13 = pneg %p1215_p9 }
  0x11   : > { %p1041_p12 = scmp.ne.s32.totalorder %s1211_s11, %s1040_s16  ;;  %s1045_s24 = scalar_lea.hbm %s1324_s0, 1024 }
  0x12   : > { %p1046_p2 = scmp.lt.u32.totalorder %s1211_s11, %s1324_s0  ;;  %p1047_p3 = scmp.lt.u32.totalorder %s1045_s24, %s1040_s16 }
  0x13   : > { %p1043_p0 = pnand %p1042_p13, %p1041_p12  ;;  %p1049_p5 = scmp.lt.u32.totalorder %s1040_s16, %s1211_s11 }
  0x14   : > { %p1048_p4 = por %p1047_p3, %p1046_p2 }
  0x15   : > { %p1044_p1 = pneg %p1043_p0 }
  0x16   : > { %p1050_p6 = por %p1049_p5, %p1048_p4 }
  0x18   : > { %p1051_p8 = pnand %p1050_p6, %p1044_p1 }
  0x1a   : > { %1054 = shalt.err (!%p1051_p8)
}
  0x1b   : > { %s1055_s28 = scalar_lea.vmem %s1219_s13, 512  ;;  %s1122_s6 = smov [#allocation2]  }
  0x1c   : > { %p1056_p12 = scmp.ne.s32.totalorder %s1219_s13, %s1055_s28  ;;  %s1060_s7 = sshll.u32 %s1122_s6, 4  ;;  %s1061_s7 = int_to_ptr.vmem [resolvable:$false] %s1060_s7 }
  0x1d   : > { %s1062_s8 = scalar_lea.vmem %s1061_s7, 1024  ;;  %p1063_p11 = scmp.lt.s32.totalorder %s1219_s13, %s1061_s7 }
  0x1e   : > { %p1058_p0 = pnand %p1056_p12, %p1042_p13  ;;  %p1064_p2 = scmp.lt.s32.totalorder %s1062_s8, %s1055_s28 }
  0x20   : > { %p1059_p10 = pneg %p1058_p0  ;;  %p1065_p3 = por %p1064_p2, %p1063_p11 }
  0x22   : > { %p1066_p4 = pnand %p1065_p3, %p1059_p10 }
  0x24   : > { %1069 = shalt.err (!%p1066_p4)
}
  0x25   : > { %983 = dma.hbm_to_vmem [thread:$0]  (!%p1215_p9), %s1211_s11, 512, %s1219_s13, %s212_s15  }
  0x26   : > { %p1333_p1 = scmp.lt.s32.totalorder %s1120_s23, 3  ;;  %p1334_p5 = scmp.ge.s32.totalorder %s1120_s23, 1 }
  0x28   : > { %p232_p13 = pnand %p1334_p5, %p1333_p1 }
  0x29   : > { %s237_s9 = sand.u32 (!%p232_p13), 1, %s1104_s19  }
  0x2a   : > { %235 = sbr.rel (%p232_p13) target bundleno = 528 (0x210), region = 40  ;;  %s957_s10 = sshll.u32 (!%p232_p13), %s237_s9, 5 }
  0x2b   : > { %s238_s12 = scalar_lea.sflag (!%p232_p13), [#allocation3], %s237_s9  ;;  %s241_s16 = scalar_lea.vmem (!%p232_p13), [#allocation2], %s957_s10 }
  0x31   : > { %1095 = dma.done.wait (%p1198_p7), %s238_s12, 512  }
  0x32   : > { %1097 = vsyncadd (%p1198_p7), %s238_s12, 4294966784  ;;  %v1123_v0 = vmov 0   ;;  %v286_v1 = vld [vmem:[%s241_s16] sm:$0xff]  ;;  %vm321_vm0 = vcmask 1041408   ;;  %v287_v2 = vld [vmem:[%s241_s16 + $0x8] sm:$0xff]  ;;  %vm284_vm1 = vcmask 31744  }
  0x33   : > { %378 = vmatprep.mubr.bf16.mxu0 %v1123_v0  ;;  %419 = vmatprep.mubr.bf16.mxu1 %v1123_v0  ;;  %v294_v3 = vcombine.high %v286_v1, %v286_v1  ;;  %v295_v4 = vcombine.high %v287_v2, %v287_v2  ;;  %v302_v5 = vpack.c.bf16 %v286_v1, %v286_v1  ;;  %v288_v7 = vld [vmem:[%s241_s16 + $0x10] sm:$0xff]  ;;  %v289_v8 = vld [vmem:[%s241_s16 + $0x18] sm:$0xff]  ;;  %v511_v13 = vld [vmem:[%s1328_s4] sm:$0xf]  ;;  %p273_p7 = scmp.lt.s32.totalorder %s1112_s21, 1 }
  0x34   : > { %1035 = vset.pattern.permute.xlu0 %v1123_v0  ;;  %v304_v6 = vpack.c.bf16 %v287_v2, %v287_v2  ;;  %v296_v9 = vcombine.high %v288_v7, %v288_v7  ;;  %v306_v10 = vpack.c.bf16 %v288_v7, %v288_v7  ;;  %v297_v11 = vcombine.high %v289_v8, %v289_v8  ;;  %v311_v20 = vld [vmem:[%s1326_s2] sm:$0xff] }
  0x35   : > { %v308_v12 = vpack.c.bf16 %v289_v8, %v289_v8  ;;  %v303_v14 = vpack.c.bf16 %v294_v3, %v294_v3  ;;  %v305_v15 = vpack.c.bf16 %v295_v4, %v295_v4  ;;  %v323_v16 = vsel %vm321_vm0, %v302_v5, 0  ;;  %514 = vperm.xlu0 %1035, %v511_v13   ;;  %v310_v21 = vld [vmem:[%s1325_s1] sm:$0xf]  ;;  %s1343_s21 = smov (!%p273_p7, %s1112_s21), 1 }
  0x36   : > { %v329_v17 = vsel %vm321_vm0, %v304_v6, 0  ;;  %v307_v18 = vpack.c.bf16 %v296_v9, %v296_v9  ;;  %v309_v19 = vpack.c.bf16 %v297_v11, %v297_v11  ;;  %v335_v22 = vsel %vm321_vm0, %v306_v10, 0  ;;  %v510_v24 = vld [vmem:[%s1327_s3] sm:$0x3]  ;;  %s958_s26 = sshll.u32 %s1343_s21, 3 }
  0x37   : > { %959 = vmatprep.subr.msk.bf16.mxu0 %vm321_vm0, %v303_v14  ;;  %961 = vmatprep.subr.msk.bf16.mxu1 %vm321_vm0, %v305_v15  ;;  %v341_v23 = vsel %vm321_vm0, %v308_v12, 0  ;;  %s276_s6 = scalar_lea.vmem %s1329_s5, %s958_s26 }
  0x38   : > { %347 = vmatpush1.bf16.msra.mxu0 %v323_v16  ;;  %388 = vmatpush1.bf16.msra.mxu1 %v329_v17 }
  0x39   : > { %963 = vmatprep.subr.msk.bf16.mxu0 %vm321_vm0, %v307_v18  ;;  %965 = vmatprep.subr.msk.bf16.mxu1 %vm321_vm0, %v309_v19 }
  0x3a   : > { %314 = vperm.xlu0 %1035, %v311_v20  }
  0x3b   : > { %960 = vmatmul.mubr.msk.bf16.vlgmr.msra.gmra.mrb[0].mxu0 %vm284_vm1, %v310_v21  ;;  %962 = vmatmul.mubr.msk.bf16.vlgmr.msra.gmra.mrb[0].mxu1 %vm284_vm1, %v310_v21 }
  0x3c   : > { %429 = vmatpush1.bf16.msra.mxu0 %v335_v22  ;;  %470 = vmatpush1.bf16.msra.mxu1 %v341_v23 }
  0x3d   : > { %460 = vmatprep.mubr.bf16.mxu0 %v1123_v0  ;;  %501 = vmatprep.mubr.bf16.mxu1 %v1123_v0 }
  0x3e   : > { %967 = vmatprep.subr.msk.bf16.mxu0 %vm321_vm0, %v303_v14  ;;  %969 = vmatprep.subr.msk.bf16.mxu1 %vm321_vm0, %v305_v15 }
  0x43   : > { %964 = vmatmul.mubr.msk.bf16.vlgmr.msra.gmra.mrb[4].mxu0 %vm284_vm1, %v310_v21  ;;  %966 = vmatmul.mubr.msk.bf16.vlgmr.msra.gmra.mrb[4].mxu1 %vm284_vm1, %v310_v21 }
  0x44   : > { %521 = vmatpush1.bf16.msra.mxu0 %v323_v16  ;;  %562 = vmatpush1.bf16.msra.mxu1 %v329_v17 }
  0x45   : > { %552 = vmatprep.mubr.bf16.mxu0 %v1123_v0  ;;  %593 = vmatprep.mubr.bf16.mxu1 %v1123_v0 }
  0x46   : > { %971 = vmatprep.subr.msk.bf16.mxu0 %vm321_vm0, %v307_v18  ;;  %973 = vmatprep.subr.msk.bf16.mxu1 %vm321_vm0, %v309_v19 }
  0x4b   : > { %968 = vmatmul.mubr.msk.bf16.vlgmr.msra.gmra.mrb[8].mxu0 %vm284_vm1, %v510_v24  ;;  %970 = vmatmul.mubr.msk.bf16.vlgmr.msra.gmra.mrb[8].mxu1 %vm284_vm1, %v510_v24 }
  0x4c   : > { %603 = vmatpush1.bf16.msra.mxu0 %v335_v22  ;;  %644 = vmatpush1.bf16.msra.mxu1 %v341_v23 }
  0x4d   : > { %634 = vmatprep.mubr.bf16.mxu0 %v1123_v0  ;;  %675 = vmatprep.mubr.bf16.mxu1 %v1123_v0 }
  0x53   : > { %972 = vmatmul.mubr.msk.bf16.vlgmr.msra.gmra.mrb[12].mxu0 %vm284_vm1, %v510_v24  ;;  %974 = vmatmul.mubr.msk.bf16.vlgmr.msra.gmra.mrb[12].mxu1 %vm284_vm1, %v510_v24 }
  0xb4   : > { %v515_v25 = vpop.permute.xlu0 %514 }
  0xb9   : > { %v1289_v26 = vpop.permute.xlu0 %314 }
 0x10e   : > { %v380_v27 = vpop.f32.mrb[0].mxu0  ;;  %v421_v28 = vpop.f32.mrb[0].mxu1 }
 0x10f   : > { %v382_v29 = vpop.f32.mrb[1].mxu0  ;;  %v423_v30 = vpop.f32.mrb[1].mxu1  ;;  %v381_v63 = vadd.f32 %v380_v27, %v1289_v26  ;;  %v422_v0 = vadd.f32 %v421_v28, %v1289_v26  ;;  %v1124_v28 = vmov 0.0  }
 0x110   : > { %v383_v31 = vadd.f32 %v382_v29, %v1289_v26  ;;  %v424_v32 = vadd.f32 %v423_v30, %v1289_v26  ;;  %v384_v33 = vpop.f32.mrb[2].mxu0  ;;  %v425_v34 = vpop.f32.mrb[2].mxu1  ;;  %285 = vst.msk [vmem:[%s276_s6] sm:$0xff] %vm284_vm1, %v1124_v28 }
 0x111   : > { %v385_v35 = vpop.f32.mrb[3].mxu0  ;;  %v426_v36 = vpop.f32.mrb[3].mxu1  ;;  %v685_v15 = vpack.c.bf16 %v381_v63, %v381_v63  ;;  %v687_v16 = vpack.c.bf16 %v422_v0, %v422_v0 }
 0x112   : > { %v686_v37 = vpack.c.bf16 %v383_v31, %v383_v31  ;;  %v688_v38 = vpack.c.bf16 %v424_v32, %v424_v32 }
 0x114   : > { %733 = vmatprep.mubr.bf16.mxu0 %v686_v37  ;;  %773 = vmatprep.mubr.bf16.mxu1 %v688_v38 }
 0x116   : > { %v462_v39 = vpop.f32.mrb[4].mxu0  ;;  %v503_v40 = vpop.f32.mrb[4].mxu1 }
 0x117   : > { %v464_v41 = vpop.f32.mrb[5].mxu0  ;;  %v505_v42 = vpop.f32.mrb[5].mxu1  ;;  %v463_v23 = vadd.f32 %v462_v39, %v1289_v26  ;;  %v504_v24 = vadd.f32 %v503_v40, %v1289_v26 }
 0x118   : > { %v466_v43 = vpop.f32.mrb[6].mxu0  ;;  %v507_v44 = vpop.f32.mrb[6].mxu1  ;;  %v465_v5 = vadd.f32 %v464_v41, %v1289_v26  ;;  %v506_v11 = vadd.f32 %v505_v42, %v1289_v26  ;;  %v684_v41 = vld [vmem:[%s276_s6] sm:$0xff] }
 0x119   : > { %v467_v45 = vpop.f32.mrb[7].mxu0  ;;  %v508_v46 = vpop.f32.mrb[7].mxu1  ;;  %v691_v27 = vpack.c.bf16 %v504_v24, %v504_v24 }
 0x11a   : > { %v690_v19 = vpack.c.bf16 %v465_v5, %v465_v5  ;;  %v692_v21 = vpack.c.bf16 %v506_v11, %v506_v11 }
 0x11e   : > { %v554_v47 = vpop.f32.mrb[8].mxu0  ;;  %v595_v48 = vpop.f32.mrb[8].mxu1 }
 0x11f   : > { %v555_v49 = vadd.f32 %v554_v47, %v515_v25  ;;  %v596_v50 = vadd.f32 %v595_v48, %v515_v25  ;;  %v556_v51 = vpop.f32.mrb[9].mxu0  ;;  %v597_v52 = vpop.f32.mrb[9].mxu1 }
 0x120   : > { %v557_v53 = vadd.f32 %v556_v51, %v515_v25  ;;  %v598_v54 = vadd.f32 %v597_v52, %v515_v25  ;;  %v558_v55 = vpop.f32.mrb[10].mxu0  ;;  %v599_v56 = vpop.f32.mrb[10].mxu1 }
 0x121   : > { %v695_v57 = vpack.c.bf16 %v596_v50, %v596_v50  ;;  %v559_v58 = vpop.f32.mrb[11].mxu0  ;;  %v600_v59 = vpop.f32.mrb[11].mxu1  ;;  %v693_v62 = vpack.c.bf16 %v555_v49, %v555_v49 }
 0x122   : > { %v694_v60 = vpack.c.bf16 %v557_v53, %v557_v53  ;;  %v696_v61 = vpack.c.bf16 %v598_v54, %v598_v54 }
 0x124   : > { %701 = vmatprep.subr.bf16.mxu0 %v694_v60  ;;  %741 = vmatprep.subr.bf16.mxu1 %v696_v61 }
 0x125   : > { %702 = vmatpush1.bf16.xpose.msra.mxu0 %v693_v62  ;;  %742 = vmatpush1.bf16.xpose.msra.mxu1 %v695_v57 }
 0x126   : > { %v636_v1 = vpop.f32.mrb[12].mxu0  ;;  %v677_v2 = vpop.f32.mrb[12].mxu1 }
 0x127   : > { %v638_v3 = vpop.f32.mrb[13].mxu0  ;;  %v679_v4 = vpop.f32.mrb[13].mxu1  ;;  %v637_v6 = vadd.f32 %v636_v1, %v515_v25  ;;  %v678_v12 = vadd.f32 %v677_v2, %v515_v25 }
 0x128   : > { %v639_v7 = vadd.f32 %v638_v3, %v515_v25  ;;  %v680_v8 = vadd.f32 %v679_v4, %v515_v25  ;;  %v640_v9 = vpop.f32.mrb[14].mxu0  ;;  %v681_v10 = vpop.f32.mrb[14].mxu1  ;;  %v689_v25 = vpack.c.bf16 %v463_v23, %v463_v23 }
 0x129   : > { %v641_v13 = vpop.f32.mrb[15].mxu0  ;;  %v682_v14 = vpop.f32.mrb[15].mxu1  ;;  %v697_v20 = vpack.c.bf16 %v637_v6, %v637_v6  ;;  %v699_v22 = vpack.c.bf16 %v678_v12, %v678_v12 }
 0x12a   : > { %v698_v17 = vpack.c.bf16 %v639_v7, %v639_v7  ;;  %v700_v18 = vpack.c.bf16 %v680_v8, %v680_v8 }
 0x12c   : > { %734 = vmatmul.mubr.bf16.vlgmr.msra.gmra.mrb[16].mxu0 %v685_v15  ;;  %774 = vmatmul.mubr.bf16.vlgmr.msra.gmra.mrb[16].mxu1 %v687_v16 }
 0x12d   : > { %781 = vmatprep.subr.bf16.mxu0 %v698_v17  ;;  %821 = vmatprep.subr.bf16.mxu1 %v700_v18 }
 0x12e   : > { %782 = vmatpush1.bf16.xpose.msra.mxu0 %v697_v20  ;;  %813 = vmatprep.mubr.bf16.mxu0 %v690_v19 }
 0x12f   : > { %822 = vmatpush1.bf16.xpose.msra.mxu1 %v699_v22  ;;  %853 = vmatprep.mubr.bf16.mxu1 %v692_v21 }
 0x135   : > { %814 = vmatmul.mubr.bf16.vlgmr.msra.gmra.mrb[20].mxu0 %v689_v25 }
 0x136   : > { %854 = vmatmul.mubr.bf16.vlgmr.msra.gmra.mrb[20].mxu1 %v691_v27 }
 0x1ff   : > { %v735_v29 = vpop.f32.mrb[16].mxu0  ;;  %v775_v30 = vpop.f32.mrb[16].mxu1 }
 0x200   : > { %v776_v31 = vadd.f32 %v775_v30, %v735_v29  ;;  %v737_v32 = vpop.f32.mrb[17].mxu0  ;;  %v777_v33 = vpop.f32.mrb[17].mxu1 }
 0x201   : > { %v738_v26 = vpop.f32.mrb[18].mxu0  ;;  %v778_v34 = vpop.f32.mrb[18].mxu1 }
 0x202   : > { %v739_v35 = vpop.f32.mrb[19].mxu0  ;;  %v779_v36 = vpop.f32.mrb[19].mxu1 }
 0x208   : > { %v815_v37 = vpop.f32.mrb[20].mxu0 }
 0x209   : > { %v816_v38 = vadd.f32 %v815_v37, %v776_v31  ;;  %v855_v39 = vpop.f32.mrb[20].mxu1  ;;  %v817_v40 = vpop.f32.mrb[21].mxu0 }
 0x20a   : > { %v857_v42 = vpop.f32.mrb[21].mxu1  ;;  %v818_v43 = vpop.f32.mrb[22].mxu0 }
 0x20b   : > { %v856_v44 = vadd.f32 %v855_v39, %v816_v38  ;;  %v858_v45 = vpop.f32.mrb[22].mxu1  ;;  %v819_v46 = vpop.f32.mrb[23].mxu0 }
 0x20c   : > { %v859_v47 = vpop.f32.mrb[23].mxu1 }
 0x20d   : > { %v861_v48 = vadd.f32 %v856_v44, %v684_v41 }
 0x20f   : > { %862 = vst.msk [vmem:[%s276_s6] sm:$0xff] %vm284_vm1, %v861_v48 }
 0x210 PF: > { %s18_s23 = sadd.s32 1, %s1120_s23   ;;  %s1335_s18 = smov %s1104_s19 }
 0x211   : > { %p15_p9 = scmp.ge.s32.totalorder %s18_s23, 4   ;;  %s1336_s19 = smov %s1108_s20 }
 0x212   : > { %s1337_s20 = smov %s1204_s30  ;;  %s1338_s21 = smov %s1116_s22 }
 0x213   : > { %s1339_s22 = smov %s1341_s25  ;;  %17 = sbr.rel (!%p15_p9) target bundleno = 4 (0x4), region = 84 }
 0x21a   :  { %888 = vsyncpa [#allocation3], 1 }
 0x21b   :  { %890 = vsyncpa [#allocation3 + $0x1], 1 }

</bundles_post_ra>
